<compile_context>
chip_gen: v5e
topology: v5e:2x2
jax: 0.10.0
libtpu: 0.0.40
codegen_flags: <defaults>
</compile_context>

<pallas_src>
import jax
import jax.numpy as jnp
from jax.experimental import pallas as pl
from jax.experimental.pallas import tpu as pltpu


def linear_probe_kernel(x_ref, w_ref, b_ref, o_ref):
    # x_ref: (TB, D) native dtype   w_ref: (1, D)   b_ref: (1, 1) SMEM   o_ref: (TB, 1) f32
    x = x_ref[...].astype(jnp.float32)            # cast per-tile, in-kernel only
    w = w_ref[...].astype(jnp.float32)            # lane-dense (1, D) weight
    # VPU elementwise mul + lane (XLU) reduce, f32 accumulation — hides under the DMA.
    acc = jnp.sum(x * w, axis=-1, keepdims=True)  # (TB, 1)
    o_ref[...] = (acc + b_ref[0, 0]).astype(o_ref.dtype)


def _pick_batch_tile(B, D, itemsize):
    """Largest batch tile whose double-buffered x block stays well under VMEM."""
    budget = 16 * 1024 * 1024                     # conservative: fits v7x's scoped VMEM
    tb = budget // max(1, 2 * D * itemsize)       # 2 = double buffering of the x block
    tb = max(8, min(tb, 2048))
    tb = (tb // 8) * 8                            # sublane-aligned
    if B <= tb:
        return B                                  # single full-extent block, no padding
    return tb


def linear_probe(x, weight, bias):
    """x: (B, D) any float dtype; weight: (1, D) (PyTorch layout); bias: (1,). Returns (B, 1) f32."""
    B, D = x.shape
    w = weight.reshape(1, D)                      # keep lane-dense; NO transpose
    b = bias.reshape(1, 1).astype(jnp.float32)    # scalar bias -> SMEM

    tb = _pick_batch_tile(B, D, jnp.dtype(x.dtype).itemsize)
    num_tiles = pl.cdiv(B, tb)
    Bp = num_tiles * tb
    if Bp != B:
        # Pad the ragged last tile; padded rows are computed and sliced off below.
        x = jnp.pad(x, ((0, Bp - B), (0, 0)))

    out = pl.pallas_call(
        linear_probe_kernel,
        out_shape=jax.ShapeDtypeStruct((Bp, 1), jnp.float32),
        grid=(num_tiles,),
        in_specs=[
            pl.BlockSpec((tb, D), lambda i: (i, 0)),                 # x: stream batch tiles
            pl.BlockSpec((1, D), lambda i: (0, 0)),                  # weight: resident, lane-dense
            pl.BlockSpec((1, 1), lambda i: (0, 0),
                         memory_space=pltpu.MemorySpace.SMEM),       # bias: scalar in SMEM
        ],
        out_specs=pl.BlockSpec((tb, 1), lambda i: (i, 0)),
        compiler_params=pltpu.CompilerParams(
            dimension_semantics=("parallel",)),                      # shard across TCs on v7x
    )(x, w, b)

    return out[:B]


if __name__ == "__main__":
    key = jax.random.PRNGKey(0)
    B, D = 8, 32  # batch=8, input_dim=32 (small demo shapes)

    kx, kw, kb = jax.random.split(key, 3)
    x = jax.random.normal(kx, (B, D), dtype=jnp.float32)

    # Deterministic parameter init mimicking torch.nn.Linear default:
    # U(-1/sqrt(D), 1/sqrt(D)) for both weight (1, D) and bias (1,)
    bound = 1.0 / jnp.sqrt(jnp.float32(D))
    weight = jax.random.uniform(kw, (1, D), minval=-bound, maxval=bound,
                                dtype=jnp.float32)
    bias = jax.random.uniform(kb, (1,), minval=-bound, maxval=bound,
                              dtype=jnp.float32)

    out = linear_probe(x, weight, bias)
    out = jax.block_until_ready(out)

    # Correctness check against plain-JAX reference of nn.Linear semantics.
    ref = x @ weight.T + bias
    assert out.shape == (B, 1)
    assert jnp.allclose(out, ref, atol=1e-5, rtol=1e-5)

    print("KERNEL_OK")
</pallas_src>

<mosaic_0001>
module attributes {stable_mosaic.version = 11 : i64} {
  func.func @linear_probe_kernel(%arg0: i32, %arg1: memref<8x32xf32, #tpu.memory_space<vmem>>, %arg2: memref<1x32xf32, #tpu.memory_space<vmem>>, %arg3: memref<1x1xf32, #tpu.memory_space<smem>>, %arg4: memref<8x1xf32, #tpu.memory_space<vmem>>) attributes {dimension_semantics = [#tpu.dimension_semantics<parallel>], iteration_bounds = array<i64: 1>, scalar_prefetch = 0 : i64, scratch_operands = 0 : i64, tpu.core_type = #tpu.core_type<tc>, window_params = [{transform_indices = @transform_0, window_bounds = array<i64: 8, 32>}, {pipeline_mode = #tpu.pipeline_mode<synchronous>, transform_indices = @transform_1, window_bounds = array<i64: 1, 32>}, {transform_indices = @transform_2, window_bounds = array<i64: 1, 1>}, {transform_indices = @transform_3, window_bounds = array<i64: 8, 1>}]} {
    %c0 = arith.constant 0 : index
    %c0_0 = arith.constant 0 : index
    %0 = vector.load %arg1[%c0, %c0_0] : memref<8x32xf32, #tpu.memory_space<vmem>>, vector<8x32xf32>
    %c0_1 = arith.constant 0 : index
    %c0_2 = arith.constant 0 : index
    %1 = vector.load %arg2[%c0_1, %c0_2] : memref<1x32xf32, #tpu.memory_space<vmem>>, vector<1x32xf32>
    %2 = vector.broadcast %1 : vector<1x32xf32> to vector<8x32xf32>
    %3 = arith.mulf %0, %2 : vector<8x32xf32>
    %cst = arith.constant dense<0.000000e+00> : vector<8xf32>
    %4 = vector.multi_reduction <add>, %3, %cst [1] : vector<8x32xf32> to vector<8xf32>
    %5 = vector.shape_cast %4 : vector<8xf32> to vector<8x1xf32>
    %c0_3 = arith.constant 0 : index
    %c0_4 = arith.constant 0 : index
    %6 = memref.load %arg3[%c0_3, %c0_4] : memref<1x1xf32, #tpu.memory_space<smem>>
    %7 = vector.broadcast %6 : f32 to vector<8x1xf32>
    %8 = arith.addf %5, %7 : vector<8x1xf32>
    %c0_5 = arith.constant 0 : index
    %c0_6 = arith.constant 0 : index
    %9 = vector.load %arg4[%c0_5, %c0_6] : memref<8x1xf32, #tpu.memory_space<vmem>>, vector<8x1xf32>
    tpu.vector_store %arg4[%c0_5, %c0_6], %8 {strides = array<i32>} : memref<8x1xf32, #tpu.memory_space<vmem>>, vector<8x1xf32>,
    return
  }
  func.func @transform_0(%arg0: i32) -> (i32, i32) {
    %c0_i32 = arith.constant 0 : i32
    %c0_i32_0 = arith.constant 0 : i32
    return %arg0, %c0_i32 : i32, i32
  }
  func.func @transform_1(%arg0: i32) -> (i32, i32) {
    %c0_i32 = arith.constant 0 : i32
    %c0_i32_0 = arith.constant 0 : i32
    %c0_i32_1 = arith.constant 0 : i32
    return %c0_i32, %c0_i32_0 : i32, i32
  }
  func.func @transform_2(%arg0: i32) -> (i32, i32) {
    %c0_i32 = arith.constant 0 : i32
    %c0_i32_0 = arith.constant 0 : i32
    %c0_i32_1 = arith.constant 0 : i32
    return %c0_i32, %c0_i32_0 : i32, i32
  }
  func.func @transform_3(%arg0: i32) -> (i32, i32) {
    %c0_i32 = arith.constant 0 : i32
    %c0_i32_0 = arith.constant 0 : i32
    return %arg0, %c0_i32 : i32, i32
  }
}

</mosaic_0001>

<bundles_post_ra>
// kernel: tpu_custom_call.1
= control target key start
LH: loop header
LB: loop body
LE: loop exit
PB: predicated region body
PF: predicated region fallthrough
CT: control target
= control target key end

     0   :  { %9 = vsyncpa [#allocation4], 0  ;;  %s77_s15 = smov [#allocation3]   ;;  %s110_s0 = inlined_call_operand.hbm [shape: f32[8,32], index: 0, kind: input, shape index: {}]   ;;  %s111_s1 = inlined_call_operand.vmem [shape: f32[1,32], index: 1, kind: input, shape index: {}]   ;;  %s112_s2 = inlined_call_operand.<no memory space> [shape: f32[1,1], index: 2, kind: input, shape index: {}]   ;;  %s113_s3 = inlined_call_operand.vmem [shape: f32[8,1], index: 3, kind: output, shape index: {}]  }
   0x1   :  { %s15_s14 = sshll.u32 %s110_s0, 4  ;;  %s17_s16 = sshll.u32 %s77_s15, 4  ;;  %s16_s14 = int_to_ptr.hbm [resolvable:$true] %s15_s14  ;;  %s18_s16 = int_to_ptr.vmem [resolvable:$true] %s17_s16 }
   0x2   :  { %20 = dma.hbm_to_vmem [thread:$0]  %s16_s14, 128, %s18_s16, [#allocation4]  }
   0x3   :  { %75 = dma.done.wait [#allocation4], 128  }
   0x4   :  { %76 = vsyncadd [#allocation4], 4294967168  ;;  %v29_v0 = vld [vmem:[#allocation3] sm:$0xff]  ;;  %vm35_vm0 = vcmask 261120   ;;  %v40_v4 = vstv %s112_s2  ;;  %vm42_vm1 = vcmask 7168  }
   0x5   :  { %v50_v1 = vld [vmem:[%s111_s1] ss:$0 sm:$0xff] }
   0x6   :  { %v34_v2 = vmul.f32 %v50_v1, %v29_v0 }
   0x8   :  { %v36_v3 = vsel %vm35_vm0, %v34_v2, 0.0 }
   0x9   :  { %37 = vadd.xlane.f32.xlu0 %v36_v3 }
  0x7c   :  { %v38_v5 = vpop.xlane.xlu0 %37 }
  0x7d   :  { %v41_v6 = vadd.f32 %v40_v4, %v38_v5 }
  0x7f   :  { %43 = vst.msk [vmem:[%s113_s3] sm:$0xff] %vm42_vm1, %v41_v6 }
  0x80   :  { %48 = vsyncpa [#allocation4], 1 }

</bundles_post_ra>
